<compile_context>
chip_gen: v6e
topology: v6e:2x2x1
jax: 0.10.0
libtpu: 0.0.40
codegen_flags: <defaults>
</compile_context>

<pallas_src>
import functools

import jax
import jax.numpy as jnp
from jax import lax
from jax.experimental import pallas as pl
from jax.experimental.pallas import tpu as pltpu


def _rbm_kernel(v_ref, wt_ref, w_ref, hbias_ref, vbias_ref, uh_ref, uv_ref,
                vk_out_ref, hk_out_ref, *, k):
    v = v_ref[...]                       # [TB, n_vis] f32
    Wt = wt_ref[...]                     # [n_vis, n_hid] bf16  (v -> h)
    W = w_ref[...]                       # [n_hid, n_vis] bf16  (h -> v)
    TB = v.shape[0]
    n_hid, n_vis = W.shape

    # Hoist bias broadcasts out of the unrolled Gibbs loop (no CSE of broadcasts).
    h_bias_b = jnp.broadcast_to(hbias_ref[...], (TB, n_hid))
    v_bias_b = jnp.broadcast_to(vbias_ref[...], (TB, n_vis))

    def v_to_h(vv, u):
        # sigmoid(v @ W.T + h_bias); rhs pre-transposed -> plain (1,0) contraction.
        logits = lax.dot_general(vv.astype(jnp.bfloat16), Wt,
                                 (((1,), (0,)), ((), ())),
                                 preferred_element_type=jnp.float32) + h_bias_b
        p_h = jax.nn.sigmoid(logits)
        # relu(sign(p - U)) == 1.0 where p > U else 0.0
        return jnp.where(p_h > u, 1.0, 0.0).astype(jnp.float32)

    def h_to_v(hh, u):
        # sigmoid(h @ W + v_bias)
        logits = lax.dot_general(hh.astype(jnp.bfloat16), W,
                                 (((1,), (0,)), ((), ())),
                                 preferred_element_type=jnp.float32) + v_bias_b
        p_v = jax.nn.sigmoid(logits)
        return jnp.where(p_v > u, 1.0, 0.0).astype(jnp.float32)

    h = v_to_h(v, uh_ref[0])
    v_k = v
    # k is a small static int -> unroll the Gibbs chain in the kernel body.
    for i in range(k):
        v_k = h_to_v(h, uv_ref[i])
        h = v_to_h(v_k, uh_ref[i + 1])

    vk_out_ref[...] = v_k
    hk_out_ref[...] = h


def rbm_forward(v, W, v_bias, h_bias, key, *, k, batch_tile=None):
    """Pallas implementation of RBM.forward. Returns (v, v_k, h_k)."""
    B, n_vis = v.shape
    n_hid = W.shape[0]
    TB = batch_tile if batch_tile is not None else B
    assert B % TB == 0, "batch must be divisible by the batch tile"

    # Host-side uniforms for the Bernoulli draws (one slice per Gibbs step).
    k_h, k_v = jax.random.split(key)
    u_h = jax.random.uniform(k_h, (k + 1, B, n_hid), dtype=jnp.float32)
    u_v = jax.random.uniform(k_v, (k, B, n_vis), dtype=jnp.float32)

    # bf16 weights for the MXU; both orientations so no in-kernel transpose.
    Wb = W.astype(jnp.bfloat16)          # [n_hid, n_vis]
    Wt = Wb.T                            # [n_vis, n_hid]

    kernel = functools.partial(_rbm_kernel, k=k)

    out_shapes = (
        jax.ShapeDtypeStruct((B, n_vis), jnp.float32),   # v_k
        jax.ShapeDtypeStruct((B, n_hid), jnp.float32),   # h_k
    )

    v_spec = pl.BlockSpec((TB, n_vis), lambda i: (i, 0))
    wt_spec = pl.BlockSpec((n_vis, n_hid), lambda i: (0, 0))
    w_spec = pl.BlockSpec((n_hid, n_vis), lambda i: (0, 0))
    hb_spec = pl.BlockSpec((1, n_hid), lambda i: (0, 0))
    vb_spec = pl.BlockSpec((1, n_vis), lambda i: (0, 0))
    uh_spec = pl.BlockSpec((k + 1, TB, n_hid), lambda i: (0, i, 0))
    uv_spec = pl.BlockSpec((k, TB, n_vis), lambda i: (0, i, 0))
    vk_spec = pl.BlockSpec((TB, n_vis), lambda i: (i, 0))
    hk_spec = pl.BlockSpec((TB, n_hid), lambda i: (i, 0))

    v_k, h_k = pl.pallas_call(
        kernel,
        grid=(B // TB,),
        out_shape=out_shapes,
        in_specs=[v_spec, wt_spec, w_spec, hb_spec, vb_spec, uh_spec, uv_spec],
        out_specs=(vk_spec, hk_spec),
        compiler_params=pltpu.CompilerParams(
            dimension_semantics=("parallel",),
            vmem_limit_bytes=64 << 20,
        ),
    )(v, Wt, Wb, h_bias.reshape(1, n_hid), v_bias.reshape(1, n_vis), u_h, u_v)

    return v, v_k, h_k


if __name__ == "__main__":
    # Small, TPU-tile-friendly shapes consistent with the module's (n_vis, n_hid, k).
    B, N_VIS, N_HID, K = 16, 256, 128, 3
    TB = 8  # batch tile -> exercises the (parallel) batch grid

    key = jax.random.PRNGKey(0)
    k_w, k_v, k_u = jax.random.split(key, 3)

    # Deterministic parameter init mirroring __init__:
    #   W = randn(n_hid, n_vis) * 0.01, v_bias = 0, h_bias = 0
    W = jax.random.normal(k_w, (N_HID, N_VIS), dtype=jnp.float32) * 0.01
    v_bias = jnp.zeros((N_VIS,), dtype=jnp.float32)
    h_bias = jnp.zeros((N_HID,), dtype=jnp.float32)

    # Binary-ish visible input (like binarized MNIST pixels + one-hot labels)
    v_in = (jax.random.uniform(k_v, (B, N_VIS), dtype=jnp.float32) > 0.5).astype(jnp.float32)

    v_out, v_k, h_k = rbm_forward(v_in, W, v_bias, h_bias, k_u, k=K, batch_tile=TB)
    jax.block_until_ready((v_out, v_k, h_k))

    assert v_out.shape == (B, N_VIS) and v_k.shape == (B, N_VIS) and h_k.shape == (B, N_HID)
    # sampler outputs are exactly {0, 1}
    assert bool(jnp.all((v_k == 0) | (v_k == 1)))
    assert bool(jnp.all((h_k == 0) | (h_k == 1)))
    # passthrough output equals input
    assert bool(jnp.all(v_out == v_in))

    print("KERNEL_OK")
</pallas_src>

<mosaic_0001>
module attributes {stable_mosaic.version = 11 : i64} {
  func.func @_rbm_kernel(%arg0: i32, %arg1: memref<8x256xf32, #tpu.memory_space<vmem>>, %arg2: memref<256x128xbf16, #tpu.memory_space<vmem>>, %arg3: memref<128x256xbf16, #tpu.memory_space<vmem>>, %arg4: memref<1x128xf32, #tpu.memory_space<vmem>>, %arg5: memref<1x256xf32, #tpu.memory_space<vmem>>, %arg6: memref<4x8x128xf32, #tpu.memory_space<vmem>>, %arg7: memref<3x8x256xf32, #tpu.memory_space<vmem>>, %arg8: memref<8x256xf32, #tpu.memory_space<vmem>>, %arg9: memref<8x128xf32, #tpu.memory_space<vmem>>) attributes {dimension_semantics = [#tpu.dimension_semantics<parallel>], iteration_bounds = array<i64: 2>, scalar_prefetch = 0 : i64, scratch_operands = 0 : i64, tpu.core_type = #tpu.core_type<tc>, window_params = [{transform_indices = @transform_0, window_bounds = array<i64: 8, 256>}, {pipeline_mode = #tpu.pipeline_mode<synchronous>, transform_indices = @transform_1, window_bounds = array<i64: 256, 128>}, {pipeline_mode = #tpu.pipeline_mode<synchronous>, transform_indices = @transform_2, window_bounds = array<i64: 128, 256>}, {pipeline_mode = #tpu.pipeline_mode<synchronous>, transform_indices = @transform_3, window_bounds = array<i64: 1, 128>}, {pipeline_mode = #tpu.pipeline_mode<synchronous>, transform_indices = @transform_4, window_bounds = array<i64: 1, 256>}, {transform_indices = @transform_5, window_bounds = array<i64: 4, 8, 128>}, {transform_indices = @transform_6, window_bounds = array<i64: 3, 8, 256>}, {transform_indices = @transform_7, window_bounds = array<i64: 8, 256>}, {transform_indices = @transform_8, window_bounds = array<i64: 8, 128>}]} {
    %c0 = arith.constant 0 : index
    %c0_0 = arith.constant 0 : index
    %0 = vector.load %arg1[%c0, %c0_0] : memref<8x256xf32, #tpu.memory_space<vmem>>, vector<8x256xf32>
    %c0_1 = arith.constant 0 : index
    %c0_2 = arith.constant 0 : index
    %1 = vector.load %arg2[%c0_1, %c0_2] : memref<256x128xbf16, #tpu.memory_space<vmem>>, vector<256x128xbf16>
    %c0_3 = arith.constant 0 : index
    %c0_4 = arith.constant 0 : index
    %2 = vector.load %arg3[%c0_3, %c0_4] : memref<128x256xbf16, #tpu.memory_space<vmem>>, vector<128x256xbf16>
    %c0_5 = arith.constant 0 : index
    %c0_6 = arith.constant 0 : index
    %3 = vector.load %arg4[%c0_5, %c0_6] : memref<1x128xf32, #tpu.memory_space<vmem>>, vector<1x128xf32>
    %4 = vector.shape_cast %3 : vector<1x128xf32> to vector<1x128xf32>
    %5 = vector.broadcast %4 : vector<1x128xf32> to vector<8x128xf32>
    %c0_7 = arith.constant 0 : index
    %c0_8 = arith.constant 0 : index
    %6 = vector.load %arg5[%c0_7, %c0_8] : memref<1x256xf32, #tpu.memory_space<vmem>>, vector<1x256xf32>
    %7 = vector.shape_cast %6 : vector<1x256xf32> to vector<1x256xf32>
    %8 = vector.broadcast %7 : vector<1x256xf32> to vector<8x256xf32>
    %c0_9 = arith.constant 0 : index
    %c0_10 = arith.constant 0 : index
    %c0_11 = arith.constant 0 : index
    %9 = vector.load %arg6[%c0_9, %c0_10, %c0_11] : memref<4x8x128xf32, #tpu.memory_space<vmem>>, vector<1x8x128xf32>
    %10 = vector.shape_cast %9 : vector<1x8x128xf32> to vector<8x128xf32>
    %11 = arith.truncf %0 : vector<8x256xf32> to vector<8x256xbf16>
    %cst = arith.constant dense<0.000000e+00> : vector<8x128xf32>
    %12 = tpu.matmul %11, %1, %cst {dimension_numbers = #tpu.dot_dimension_numbers<[1], [0], [0], [1], [0, 0, 1, 1], [], []>} : vector<8x256xbf16>, vector<256x128xbf16>, vector<8x128xf32> -> vector<8x128xf32>
    %13 = arith.addf %12, %5 : vector<8x128xf32>
    %14 = arith.negf %13 : vector<8x128xf32>
    %15 = math.exp %14 : vector<8x128xf32>
    %cst_12 = arith.constant 1.000000e+00 : f32
    %16 = vector.broadcast %cst_12 : f32 to vector<8x128xf32>
    %17 = arith.addf %16, %15 : vector<8x128xf32>
    %18 = arith.divf %16, %17 : vector<8x128xf32>
    %19 = arith.cmpf ogt, %18, %10 : vector<8x128xf32>
    %cst_13 = arith.constant 1.000000e+00 : f32
    %cst_14 = arith.constant 0.000000e+00 : f32
    %20 = vector.broadcast %cst_13 : f32 to vector<8x128xf32>
    %21 = vector.broadcast %cst_14 : f32 to vector<8x128xf32>
    %22 = arith.select %19, %20, %21 : vector<8x128xi1>, vector<8x128xf32>
    %c0_15 = arith.constant 0 : index
    %c0_16 = arith.constant 0 : index
    %c0_17 = arith.constant 0 : index
    %23 = vector.load %arg7[%c0_15, %c0_16, %c0_17] : memref<3x8x256xf32, #tpu.memory_space<vmem>>, vector<1x8x256xf32>
    %24 = vector.shape_cast %23 : vector<1x8x256xf32> to vector<8x256xf32>
    %25 = arith.truncf %22 : vector<8x128xf32> to vector<8x128xbf16>
    %cst_18 = arith.constant dense<0.000000e+00> : vector<8x256xf32>
    %26 = tpu.matmul %25, %2, %cst_18 {dimension_numbers = #tpu.dot_dimension_numbers<[1], [0], [0], [1], [0, 0, 1, 1], [], []>} : vector<8x128xbf16>, vector<128x256xbf16>, vector<8x256xf32> -> vector<8x256xf32>
    %27 = arith.addf %26, %8 : vector<8x256xf32>
    %28 = arith.negf %27 : vector<8x256xf32>
    %29 = math.exp %28 : vector<8x256xf32>
    %cst_19 = arith.constant 1.000000e+00 : f32
    %30 = vector.broadcast %cst_19 : f32 to vector<8x256xf32>
    %31 = arith.addf %30, %29 : vector<8x256xf32>
    %32 = arith.divf %30, %31 : vector<8x256xf32>
    %33 = arith.cmpf ogt, %32, %24 : vector<8x256xf32>
    %cst_20 = arith.constant 1.000000e+00 : f32
    %cst_21 = arith.constant 0.000000e+00 : f32
    %34 = vector.broadcast %cst_20 : f32 to vector<8x256xf32>
    %35 = vector.broadcast %cst_21 : f32 to vector<8x256xf32>
    %36 = arith.select %33, %34, %35 : vector<8x256xi1>, vector<8x256xf32>
    %c1 = arith.constant 1 : index
    %c0_22 = arith.constant 0 : index
    %c0_23 = arith.constant 0 : index
    %37 = vector.load %arg6[%c1, %c0_22, %c0_23] : memref<4x8x128xf32, #tpu.memory_space<vmem>>, vector<1x8x128xf32>
    %38 = vector.shape_cast %37 : vector<1x8x128xf32> to vector<8x128xf32>
    %39 = arith.truncf %36 : vector<8x256xf32> to vector<8x256xbf16>
    %cst_24 = arith.constant dense<0.000000e+00> : vector<8x128xf32>
    %40 = tpu.matmul %39, %1, %cst_24 {dimension_numbers = #tpu.dot_dimension_numbers<[1], [0], [0], [1], [0, 0, 1, 1], [], []>} : vector<8x256xbf16>, vector<256x128xbf16>, vector<8x128xf32> -> vector<8x128xf32>
    %41 = arith.addf %40, %5 : vector<8x128xf32>
    %42 = arith.negf %41 : vector<8x128xf32>
    %43 = math.exp %42 : vector<8x128xf32>
    %cst_25 = arith.constant 1.000000e+00 : f32
    %44 = vector.broadcast %cst_25 : f32 to vector<8x128xf32>
    %45 = arith.addf %44, %43 : vector<8x128xf32>
    %46 = arith.divf %44, %45 : vector<8x128xf32>
    %47 = arith.cmpf ogt, %46, %38 : vector<8x128xf32>
    %cst_26 = arith.constant 1.000000e+00 : f32
    %cst_27 = arith.constant 0.000000e+00 : f32
    %48 = vector.broadcast %cst_26 : f32 to vector<8x128xf32>
    %49 = vector.broadcast %cst_27 : f32 to vector<8x128xf32>
    %50 = arith.select %47, %48, %49 : vector<8x128xi1>, vector<8x128xf32>
    %c1_28 = arith.constant 1 : index
    %c0_29 = arith.constant 0 : index
    %c0_30 = arith.constant 0 : index
    %51 = vector.load %arg7[%c1_28, %c0_29, %c0_30] : memref<3x8x256xf32, #tpu.memory_space<vmem>>, vector<1x8x256xf32>
    %52 = vector.shape_cast %51 : vector<1x8x256xf32> to vector<8x256xf32>
    %53 = arith.truncf %50 : vector<8x128xf32> to vector<8x128xbf16>
    %cst_31 = arith.constant dense<0.000000e+00> : vector<8x256xf32>
    %54 = tpu.matmul %53, %2, %cst_31 {dimension_numbers = #tpu.dot_dimension_numbers<[1], [0], [0], [1], [0, 0, 1, 1], [], []>} : vector<8x128xbf16>, vector<128x256xbf16>, vector<8x256xf32> -> vector<8x256xf32>
    %55 = arith.addf %54, %8 : vector<8x256xf32>
    %56 = arith.negf %55 : vector<8x256xf32>
    %57 = math.exp %56 : vector<8x256xf32>
    %cst_32 = arith.constant 1.000000e+00 : f32
    %58 = vector.broadcast %cst_32 : f32 to vector<8x256xf32>
    %59 = arith.addf %58, %57 : vector<8x256xf32>
    %60 = arith.divf %58, %59 : vector<8x256xf32>
    %61 = arith.cmpf ogt, %60, %52 : vector<8x256xf32>
    %cst_33 = arith.constant 1.000000e+00 : f32
    %cst_34 = arith.constant 0.000000e+00 : f32
    %62 = vector.broadcast %cst_33 : f32 to vector<8x256xf32>
    %63 = vector.broadcast %cst_34 : f32 to vector<8x256xf32>
    %64 = arith.select %61, %62, %63 : vector<8x256xi1>, vector<8x256xf32>
    %c2 = arith.constant 2 : index
    %c0_35 = arith.constant 0 : index
    %c0_36 = arith.constant 0 : index
    %65 = vector.load %arg6[%c2, %c0_35, %c0_36] : memref<4x8x128xf32, #tpu.memory_space<vmem>>, vector<1x8x128xf32>
    %66 = vector.shape_cast %65 : vector<1x8x128xf32> to vector<8x128xf32>
    %67 = arith.truncf %64 : vector<8x256xf32> to vector<8x256xbf16>
    %cst_37 = arith.constant dense<0.000000e+00> : vector<8x128xf32>
    %68 = tpu.matmul %67, %1, %cst_37 {dimension_numbers = #tpu.dot_dimension_numbers<[1], [0], [0], [1], [0, 0, 1, 1], [], []>} : vector<8x256xbf16>, vector<256x128xbf16>, vector<8x128xf32> -> vector<8x128xf32>
    %69 = arith.addf %68, %5 : vector<8x128xf32>
    %70 = arith.negf %69 : vector<8x128xf32>
    %71 = math.exp %70 : vector<8x128xf32>
    %cst_38 = arith.constant 1.000000e+00 : f32
    %72 = vector.broadcast %cst_38 : f32 to vector<8x128xf32>
    %73 = arith.addf %72, %71 : vector<8x128xf32>
    %74 = arith.divf %72, %73 : vector<8x128xf32>
    %75 = arith.cmpf ogt, %74, %66 : vector<8x128xf32>
    %cst_39 = arith.constant 1.000000e+00 : f32
    %cst_40 = arith.constant 0.000000e+00 : f32
    %76 = vector.broadcast %cst_39 : f32 to vector<8x128xf32>
    %77 = vector.broadcast %cst_40 : f32 to vector<8x128xf32>
    %78 = arith.select %75, %76, %77 : vector<8x128xi1>, vector<8x128xf32>
    %c2_41 = arith.constant 2 : index
    %c0_42 = arith.constant 0 : index
    %c0_43 = arith.constant 0 : index
    %79 = vector.load %arg7[%c2_41, %c0_42, %c0_43] : memref<3x8x256xf32, #tpu.memory_space<vmem>>, vector<1x8x256xf32>
    %80 = vector.shape_cast %79 : vector<1x8x256xf32> to vector<8x256xf32>
    %81 = arith.truncf %78 : vector<8x128xf32> to vector<8x128xbf16>
    %cst_44 = arith.constant dense<0.000000e+00> : vector<8x256xf32>
    %82 = tpu.matmul %81, %2, %cst_44 {dimension_numbers = #tpu.dot_dimension_numbers<[1], [0], [0], [1], [0, 0, 1, 1], [], []>} : vector<8x128xbf16>, vector<128x256xbf16>, vector<8x256xf32> -> vector<8x256xf32>
    %83 = arith.addf %82, %8 : vector<8x256xf32>
    %84 = arith.negf %83 : vector<8x256xf32>
    %85 = math.exp %84 : vector<8x256xf32>
    %cst_45 = arith.constant 1.000000e+00 : f32
    %86 = vector.broadcast %cst_45 : f32 to vector<8x256xf32>
    %87 = arith.addf %86, %85 : vector<8x256xf32>
    %88 = arith.divf %86, %87 : vector<8x256xf32>
    %89 = arith.cmpf ogt, %88, %80 : vector<8x256xf32>
    %cst_46 = arith.constant 1.000000e+00 : f32
    %cst_47 = arith.constant 0.000000e+00 : f32
    %90 = vector.broadcast %cst_46 : f32 to vector<8x256xf32>
    %91 = vector.broadcast %cst_47 : f32 to vector<8x256xf32>
    %92 = arith.select %89, %90, %91 : vector<8x256xi1>, vector<8x256xf32>
    %c3 = arith.constant 3 : index
    %c0_48 = arith.constant 0 : index
    %c0_49 = arith.constant 0 : index
    %93 = vector.load %arg6[%c3, %c0_48, %c0_49] : memref<4x8x128xf32, #tpu.memory_space<vmem>>, vector<1x8x128xf32>
    %94 = vector.shape_cast %93 : vector<1x8x128xf32> to vector<8x128xf32>
    %95 = arith.truncf %92 : vector<8x256xf32> to vector<8x256xbf16>
    %cst_50 = arith.constant dense<0.000000e+00> : vector<8x128xf32>
    %96 = tpu.matmul %95, %1, %cst_50 {dimension_numbers = #tpu.dot_dimension_numbers<[1], [0], [0], [1], [0, 0, 1, 1], [], []>} : vector<8x256xbf16>, vector<256x128xbf16>, vector<8x128xf32> -> vector<8x128xf32>
    %97 = arith.addf %96, %5 : vector<8x128xf32>
    %98 = arith.negf %97 : vector<8x128xf32>
    %99 = math.exp %98 : vector<8x128xf32>
    %cst_51 = arith.constant 1.000000e+00 : f32
    %100 = vector.broadcast %cst_51 : f32 to vector<8x128xf32>
    %101 = arith.addf %100, %99 : vector<8x128xf32>
    %102 = arith.divf %100, %101 : vector<8x128xf32>
    %103 = arith.cmpf ogt, %102, %94 : vector<8x128xf32>
    %cst_52 = arith.constant 1.000000e+00 : f32
    %cst_53 = arith.constant 0.000000e+00 : f32
    %104 = vector.broadcast %cst_52 : f32 to vector<8x128xf32>
    %105 = vector.broadcast %cst_53 : f32 to vector<8x128xf32>
    %106 = arith.select %103, %104, %105 : vector<8x128xi1>, vector<8x128xf32>
    %c0_54 = arith.constant 0 : index
    %c0_55 = arith.constant 0 : index
    %107 = vector.load %arg8[%c0_54, %c0_55] : memref<8x256xf32, #tpu.memory_space<vmem>>, vector<8x256xf32>
    tpu.vector_store %arg8[%c0_54, %c0_55], %92 {strides = array<i32>} : memref<8x256xf32, #tpu.memory_space<vmem>>, vector<8x256xf32>,
    %c0_56 = arith.constant 0 : index
    %c0_57 = arith.constant 0 : index
    %108 = vector.load %arg9[%c0_56, %c0_57] : memref<8x128xf32, #tpu.memory_space<vmem>>, vector<8x128xf32>
    tpu.vector_store %arg9[%c0_56, %c0_57], %106 {strides = array<i32>} : memref<8x128xf32, #tpu.memory_space<vmem>>, vector<8x128xf32>,
    return
  }
  func.func @transform_0(%arg0: i32) -> (i32, i32) {
    %c0_i32 = arith.constant 0 : i32
    %c0_i32_0 = arith.constant 0 : i32
    return %arg0, %c0_i32 : i32, i32
  }
  func.func @transform_1(%arg0: i32) -> (i32, i32) {
    %c0_i32 = arith.constant 0 : i32
    %c0_i32_0 = arith.constant 0 : i32
    %c0_i32_1 = arith.constant 0 : i32
    return %c0_i32, %c0_i32_0 : i32, i32
  }
  func.func @transform_2(%arg0: i32) -> (i32, i32) {
    %c0_i32 = arith.constant 0 : i32
    %c0_i32_0 = arith.constant 0 : i32
    %c0_i32_1 = arith.constant 0 : i32
    return %c0_i32, %c0_i32_0 : i32, i32
  }
  func.func @transform_3(%arg0: i32) -> (i32, i32) {
    %c0_i32 = arith.constant 0 : i32
    %c0_i32_0 = arith.constant 0 : i32
    %c0_i32_1 = arith.constant 0 : i32
    return %c0_i32, %c0_i32_0 : i32, i32
  }
  func.func @transform_4(%arg0: i32) -> (i32, i32) {
    %c0_i32 = arith.constant 0 : i32
    %c0_i32_0 = arith.constant 0 : i32
    %c0_i32_1 = arith.constant 0 : i32
    return %c0_i32, %c0_i32_0 : i32, i32
  }
  func.func @transform_5(%arg0: i32) -> (i32, i32, i32) {
    %c0_i32 = arith.constant 0 : i32
    %c0_i32_0 = arith.constant 0 : i32
    %c0_i32_1 = arith.constant 0 : i32
    return %c0_i32, %arg0, %c0_i32_0 : i32, i32, i32
  }
  func.func @transform_6(%arg0: i32) -> (i32, i32, i32) {
    %c0_i32 = arith.constant 0 : i32
    %c0_i32_0 = arith.constant 0 : i32
    %c0_i32_1 = arith.constant 0 : i32
    return %c0_i32, %arg0, %c0_i32_0 : i32, i32, i32
  }
  func.func @transform_7(%arg0: i32) -> (i32, i32) {
    %c0_i32 = arith.constant 0 : i32
    %c0_i32_0 = arith.constant 0 : i32
    return %arg0, %c0_i32 : i32, i32
  }
  func.func @transform_8(%arg0: i32) -> (i32, i32) {
    %c0_i32 = arith.constant 0 : i32
    %c0_i32_0 = arith.constant 0 : i32
    return %arg0, %c0_i32 : i32, i32
  }
}

</mosaic_0001>

<bundles_post_ra>
// kernel: tpu_custom_call.1
= control target key start
LH: loop header
LB: loop body
LE: loop exit
PB: predicated region body
PF: predicated region fallthrough
CT: control target
= control target key end

     0   :  { %s2442_s0 = inlined_call_operand.hbm [shape: f32[16,256], index: 0, kind: input, shape index: {}]   ;;  %s2443_s1 = inlined_call_operand.hbm [shape: bf16[256,128], index: 1, kind: input, shape index: {}]   ;;  %s2444_s2 = inlined_call_operand.hbm [shape: bf16[128,256], index: 2, kind: input, shape index: {}]   ;;  %s2445_s3 = inlined_call_operand.vmem [shape: f32[1,128], index: 3, kind: input, shape index: {}]   ;;  %s2446_s4 = inlined_call_operand.vmem [shape: f32[1,256], index: 4, kind: input, shape index: {}]   ;;  %s2447_s5 = inlined_call_operand.hbm [shape: f32[4,16,128], index: 5, kind: input, shape index: {}]   ;;  %s2448_s6 = inlined_call_operand.hbm [shape: f32[3,16,256], index: 6, kind: input, shape index: {}]   ;;  %s2449_s7 = inlined_call_operand.hbm [shape: f32[16,256], index: 7, kind: output, shape index: {0}]   ;;  %s2450_s8 = inlined_call_operand.hbm [shape: f32[16,128], index: 8, kind: output, shape index: {1}]  }
   0x1   :  { %2465 = sst [smem:[#allocation24_spill]] %s2443_s1 }
   0x2   :  { %2466 = sst [smem:[#allocation25_spill]] %s2447_s5 }
   0x3   :  { %2467 = sst [smem:[#allocation26_spill]] %s2450_s8 }
   0x4   :  { %14 = vsyncpa [#allocation3], 0 }
   0x5   :  { %16 = vsyncpa [#allocation3 + $0x1], 0 }
   0x6   :  { %17 = vsyncpa [#allocation6], 0 }
   0x7   :  { %18 = vsyncpa [#allocation9], 0 }
   0x8   :  { %20 = vsyncpa [#allocation9 + $0x1], 0 }
   0x9   :  { %21 = vsyncpa [#allocation4], 0 }
   0xa   :  { %23 = vsyncpa [#allocation4 + $0x1], 0 }
   0xb   :  { %24 = vsyncpa [#allocation13], 0 }
   0xc   :  { %26 = vsyncpa [#allocation13 + $0x1], 0  ;;  %s1934_s27 = smov 0   ;;  %s1936_s28 = smov 0  }
   0xd   :  { %s1938_s29 = smov 0   ;;  %s1940_s30 = smov 0  }
   0xe LB: > { %2468 = sst [smem:[#allocation19_spill]] %s1858_s27  ;;  %s1955_s9 = sadd.s32 4294967295, %s1870_s30   ;;  %s1870_s30 = sphi %s1940_s30, %s2496_s30   ;;  %s1866_s29 = sphi %s1938_s29, %s2498_s29   ;;  %s1862_s28 = sphi %s1936_s28, %s2500_s28   ;;  %s1858_s27 = sphi %s1934_s27, %s2499_s27  }
   0xf   : > { %2469 = sst [smem:[#allocation20_spill]] %s1866_s29  ;;  %s1273_s10 = sadd.s32 4294967294, %s1870_s30  }
  0x10   : > { %s1959_s11 = sadd.s32 1, %s1870_s30   ;;  %s39_s12 = sadd.s32 1, %s1866_s29 }
  0x11   : > { %2470 = sst [smem:[#allocation21_spill]] %s1959_s11  ;;  %s36_s13 = ssub.s32 %s1870_s30, %s1959_s11 }
  0x12   : > { %p46_p0 = scmp.ne.s32.totalorder %s1866_s29, %s1862_s28  ;;  %p37_p1 = scmp.eq.s32.totalorder %s36_s13, 0 }
  0x13   : > { %p47_p2 = scmp.eq.s32.totalorder %s1870_s30, 0  ;;  %p52_p3 = scmp.ne.s32.totalorder %s1862_s28, %s1858_s27 }
  0x14   : > { %p2458_p4 = scmp.eq.s32.totalorder %s1955_s9, 0  ;;  %p212_p7 = scmp.eq.s32.totalorder %s1955_s9, 1 }
  0x15   : > { %s1971_s14 = scalar_select %p37_p1, %s1866_s29, %s39_s12  }
  0x16   : > { %p1973_p5 = por %p47_p2, %p46_p0  ;;  %p1979_p6 = por %p2458_p4, %p52_p3 }
  0x17   : > { %2471 = sst [smem:[#allocation22_spill]] %s1971_s14  ;;  %p218_p8 = scmp.eq.s32.totalorder %s1273_s10, 1 }
  0x18   : > { %s2473_s16 = scalar_select %p1979_p6, 1, 0 }
  0x19   : > { %p1274_p9 = scmp.ge.s32.totalorder %s1870_s30, 1  ;;  %p251_p10 = scmp.lt.s32.totalorder %s1870_s30, 3 }
  0x1a   : > { %p1986_p11 = por %p212_p7, %p46_p0  ;;  %p1990_p12 = por %p218_p8, %p52_p3 }
  0x1b   : > { %p1994_p13 = pnand %p1274_p9, %p251_p10  ;;  %s1872_s20 = smov [#allocation5]  }
  0x1c   : > { %s2474_s17 = scalar_select %p1986_p11, 1, 0 }
  0x1d   : > { %s2475_s18 = scalar_select %p1990_p12, 1, 0 }
  0x1e   : > { %s2477_s19 = scalar_select %p1994_p13, 1, 0 }
  0x1f   : > { %2476 = sst [smem:[#allocation23_spill]] %s2475_s18  ;;  %p1478_p1 = pneg %p1994_p13 }
  0x20   : > { %s263_s21 = sshll.u32 %s1872_s20, 4  ;;  %p1504_p3 = scmp.lt.s32.totalorder %s1870_s30, 2  ;;  %s264_s21 = int_to_ptr.vmem [resolvable:$true] %s263_s21 }
  0x21   : > { %p2002_p2 = pnand %p1478_p1, %p2458_p4  ;;  %s1643_s23 = scalar_lea.vmem %s264_s21, 2048 }
  0x22   : > { %p1644_p8 = scmp.ne.s32.totalorder %s264_s21, %s1643_s23  ;;  %p1651_p12 = scmp.lt.s32.totalorder %s264_s21, %s264_s21 }
  0x23   : > { %s2478_s22 = scalar_select %p2002_p2, 1, 0 }
  0x24   : > { %p2459_p7 = pneg %p2002_p2  ;;  %p1652_p11 = scmp.lt.s32.totalorder %s1643_s23, %s1643_s23 }
  0x26   : > { %p1646_p9 = pnand %p1644_p8, %p2459_p7  ;;  %p1653_p6 = por %p1652_p11, %p1651_p12 }
  0x28   : > { %p1647_p10 = pneg %p1646_p9 }
  0x2a   : > { %p1654_p13 = pnand %p1653_p6, %p1647_p10 }
  0x2c   : > { %1657 = shalt.err (!%p1654_p13)
}
  0x2d   : > { %s1873_s24 = smov 64   ;;  %s1874_s25 = smov 4  }
  0x2e   : > { %s2479_s1 = sld [smem:[#allocation24_spill]]  ;;  %p2022_p1 = pnand %p1504_p3, %p1973_p5 }
  0x2f   : > { %s2027_s13 = sand.u32 1, %s1866_s29   ;;  %s315_s20 = sand.u32 1, %s1870_s30  }
  0x30   : > { %s1281_s23 = sshll.u32 %s2027_s13, 5  ;;  %s1282_s14 = sshll.u32 %s1870_s30, 7 }
  0x31   : > { %s2481_s5 = sld [smem:[#allocation25_spill]]  ;;  %s319_s15 = scalar_lea.vmem [#allocation8], %s1281_s23 }
  0x32   : > { %p2045_p6 = pneg %p2022_p1 }
  0x34   : > { %1481 = dma.hbm_to_vmem [thread:$0]  (!%p2002_p2), %s2479_s1, 2048, %s264_s21, [#allocation6], %s1873_s24, %s1873_s24, %s1874_s25  }
  0x35   : > { %s325_s21 = sshll.u32 %s319_s15, 4  ;;  %s2039_s24 = scalar_lea.sflag [#allocation9], %s315_s20  ;;  %s2037_s21 = int_to_ptr.vmem [resolvable:$true] %s325_s21 }
  0x37   : > { %s2035_s27 = scalar_lea.hbm %s2481_s5, %s1282_s14  ;;  %s1663_s18 = scalar_lea.hbm %s2481_s5, 1024 }
  0x38   : > { %s1658_s25 = scalar_lea.hbm %s2035_s27, 512  ;;  %p1664_p13 = scmp.lt.s32.totalorder %s2035_s27, %s2481_s5 }
  0x39   : > { %p1659_p5 = scmp.ne.s32.totalorder %s2035_s27, %s1658_s25  ;;  %p1665_p3 = scmp.lt.s32.totalorder %s1663_s18, %s1658_s25 }
  0x3b   : > { %p1661_p11 = pnand %p2045_p6, %p1659_p5  ;;  %p1666_p8 = por %p1665_p3, %p1664_p13 }
  0x3d   : > { %p1662_p12 = pneg %p1661_p11 }
  0x3f   : > { %p1667_p9 = pnand %p1666_p8, %p1662_p12 }
  0x41   : > { %1670 = shalt.err (!%p1667_p9)
}
  0x42   : > { %s1671_s20 = scalar_lea.vmem %s2037_s21, 512  ;;  %s1875_s15 = smov [#allocation8]  }
  0x43   : > { %p1672_p10 = scmp.ne.s32.totalorder %s2037_s21, %s1671_s20  ;;  %s1676_s11 = sshll.u32 %s1875_s15, 4  ;;  %s1677_s11 = int_to_ptr.vmem [resolvable:$false] %s1676_s11 }
  0x44   : > { %s1678_s14 = scalar_lea.vmem %s1677_s11, 1024  ;;  %p1679_p0 = scmp.lt.s32.totalorder %s2037_s21, %s1677_s11 }
  0x45   : > { %p1674_p5 = pnand %p1672_p10, %p2045_p6  ;;  %p1680_p4 = scmp.lt.s32.totalorder %s1678_s14, %s1671_s20 }
  0x47   : > { %p1675_p11 = pneg %p1674_p5  ;;  %p1681_p7 = por %p1680_p4, %p1679_p0 }
  0x49   : > { %p1682_p2 = pnand %p1681_p7, %p1675_p11 }
  0x4b   : > { %1685 = shalt.err (!%p1682_p2)
}
  0x4c   : > { %s2462_s25 = smov 256   ;;  %s1877_s18 = smov 128  }
  0x4d   : > { %s1878_s10 = smov 8   ;;  %s1879_s23 = smov [#allocation7]  }
  0x4e   : > { %1491 = dma.hbm_to_vmem [thread:$0]  (!%p2022_p1), %s2035_s27, 512, %s2037_s21, %s2039_s24, %s2462_s25, %s1877_s18, %s1878_s10  }
  0x4f   : > { %s276_s15 = sshll.u32 %s1879_s23, 4  ;;  %s1278_s1 = sshll.u32 %s2027_s13, 4  ;;  %s277_s15 = int_to_ptr.vmem [resolvable:$true] %s276_s15 }
  0x50   : > { %s1697_s20 = scalar_lea.vmem %s277_s15, 2048  ;;  %p2483_p0 = scmp.ne.s32.totalorder %s2478_s22, 0 }
  0x51   : > { %p1698_p4 = scmp.ne.s32.totalorder %s277_s15, %s1697_s20  ;;  %p1705_p13 = scmp.lt.s32.totalorder %s277_s15, %s277_s15 }
  0x52   : > { %p2484_p2 = pneg %p2483_p0  ;;  %p1706_p3 = scmp.lt.s32.totalorder %s1697_s20, %s1697_s20 }
  0x54   : > { %p1700_p7 = pnand %p1698_p4, %p2484_p2  ;;  %p1707_p8 = por %p1706_p3, %p1705_p13 }
  0x56   : > { %p1701_p12 = pneg %p1700_p7 }
  0x58   : > { %p1708_p9 = pnand %p1707_p8, %p1701_p12 }
  0x5a   : > { %1711 = shalt.err (!%p1708_p9)
}
  0x5b   : > { %1484 = dma.hbm_to_vmem [thread:$0]  (!%p2483_p0), %s2444_s2, 2048, %s277_s15, [#allocation6], %s1877_s18, %s1877_s18, %s1878_s10  }
  0x5c   : > { %s1367_s27 = sshll.u32 %s1870_s30, 8  ;;  %s300_s21 = scalar_lea.vmem [#allocation2], %s1278_s1 }
  0x5d   : > { %s308_s23 = sshll.u32 %s300_s21, 4  ;;  %s306_s20 = scalar_lea.hbm %s2442_s0, %s1367_s27  ;;  %s309_s23 = int_to_ptr.vmem [resolvable:$true] %s308_s23 }
  0x5e   : > { %s297_s29 = scalar_lea.sflag [#allocation3], %s2027_s13  ;;  %s1712_s8 = scalar_lea.hbm %s306_s20, 256 }
  0x5f   : > { %p1713_p10 = scmp.ne.s32.totalorder %s306_s20, %s1712_s8  ;;  %s1717_s14 = scalar_lea.hbm %s2442_s0, 512 }
  0x60   : > { %p1718_p4 = scmp.lt.s32.totalorder %s306_s20, %s2442_s0  ;;  %p1719_p0 = scmp.lt.s32.totalorder %s1717_s14, %s1712_s8 }
  0x61   : > { %p1715_p5 = pnand %p1713_p10, %p2045_p6 }
  0x62   : > { %p1720_p2 = por %p1719_p0, %p1718_p4 }
  0x63   : > { %p1716_p11 = pneg %p1715_p5 }
  0x65   : > { %p1721_p7 = pnand %p1720_p2, %p1716_p11 }
  0x67   : > { %1724 = shalt.err (!%p1721_p7)
}
  0x68   : > { %s1725_s1 = scalar_lea.vmem %s309_s23, 256  ;;  %s1880_s5 = smov [#allocation2]  }
  0x69   : > { %p1726_p12 = scmp.ne.s32.totalorder %s309_s23, %s1725_s1  ;;  %s1730_s25 = sshll.u32 %s1880_s5, 4  ;;  %s1731_s25 = int_to_ptr.vmem [resolvable:$false] %s1730_s25 }
  0x6a   : > { %s1732_s15 = scalar_lea.vmem %s1731_s25, 512  ;;  %p1733_p8 = scmp.lt.s32.totalorder %s309_s23, %s1731_s25 }
  0x6b   : > { %p1728_p13 = pnand %p1726_p12, %p2045_p6  ;;  %p1734_p9 = scmp.lt.s32.totalorder %s1732_s15, %s1725_s1 }
  0x6d   : > { %p1729_p3 = pneg %p1728_p13  ;;  %p1735_p10 = por %p1734_p9, %p1733_p8 }
  0x6f   : > { %p1736_p5 = pnand %p1735_p10, %p1729_p3 }
  0x71   : > { %1739 = shalt.err (!%p1736_p5)
}
  0x72   : > { %1488 = dma.hbm_to_vmem [thread:$0]  (!%p2022_p1), %s306_s20, 256, %s309_s23, %s297_s29  }
  0x73   : > { %s1458_s8 = smul.u32 48, %s2027_s13  ;;  %s2103_s11 = scalar_lea.hbm %s2448_s6, %s1367_s27 }
  0x74   : > { %s1740_s10 = scalar_lea.hbm %s2103_s11, 768  ;;  %s1745_s23 = scalar_lea.hbm %s2448_s6, 1536 }
  0x75   : > { %s339_s14 = scalar_lea.vmem [#allocation10], %s1458_s8  ;;  %p1741_p11 = scmp.ne.s32.totalorder %s2103_s11, %s1740_s10 }
  0x76   : > { %s346_s18 = sshll.u32 %s339_s14, 4  ;;  %p1746_p2 = scmp.lt.s32.totalorder %s2103_s11, %s2448_s6  ;;  %s2105_s18 = int_to_ptr.vmem [resolvable:$true] %s346_s18 }
  0x77   : > { %p1743_p4 = pnand %p1741_p11, %p2045_p6  ;;  %p1747_p7 = scmp.lt.s32.totalorder %s1745_s23, %s1740_s10 }
  0x79   : > { %p1744_p0 = pneg %p1743_p4  ;;  %p1748_p12 = por %p1747_p7, %p1746_p2 }
  0x7b   : > { %p1749_p13 = pnand %p1748_p12, %p1744_p0 }
  0x7d   : > { %1752 = shalt.err (!%p1749_p13)
}
  0x7e   : > { %s1753_s27 = scalar_lea.vmem %s2105_s18, 768  ;;  %s1881_s5 = smov [#allocation10]  }
  0x7f   : > { %p1754_p3 = scmp.ne.s32.totalorder %s2105_s18, %s1753_s27  ;;  %s1758_s25 = sshll.u32 %s1881_s5, 4  ;;  %s1759_s25 = int_to_ptr.vmem [resolvable:$false] %s1758_s25 }
  0x80   : > { %s1760_s15 = scalar_lea.vmem %s1759_s25, 1536  ;;  %p1761_p10 = scmp.lt.s32.totalorder %s2105_s18, %s1759_s25 }
  0x81   : > { %p1756_p8 = pnand %p1754_p3, %p2045_p6  ;;  %p1762_p5 = scmp.lt.s32.totalorder %s1760_s15, %s1753_s27 }
  0x83   : > { %p1757_p9 = pneg %p1756_p8  ;;  %p1763_p11 = por %p1762_p5, %p1761_p10 }
  0x85   : > { %p1764_p4 = pnand %p1763_p11, %p1757_p9 }
  0x87   : > { %1767 = shalt.err (!%p1764_p4)
}
  0x88   : > { %s1882_s8 = smov 512   ;;  %s1883_s21 = smov 16  }
  0x89   : > { %s2485_s22 = smov 256   ;;  %p2486_p6 = scmp.ne.s32.totalorder %s2477_s19, 0 }
  0x8a   : > { %1494 = dma.hbm_to_vmem [thread:$0]  (!%p2022_p1), %s2103_s11, 768, %s2105_s18, %s2039_s24, %s1882_s8, %s2485_s22, %s1883_s21  }
  0x8b   : > { %358 = sbr.rel (%p2486_p6) target bundleno = 1825 (0x721), region = 48  ;;  %s2132_s26 = sand.u32 (!%p2486_p6), 1, %s1862_s28  }
  0x8c   : > { %s1286_s14 = sshll.u32 (!%p2486_p6), %s2132_s26, 4  ;;  %s361_s10 = scalar_lea.sflag (!%p2486_p6), [#allocation3], %s2132_s26 }
  0x8d   : > { %s2138_s29 = scalar_lea.vmem (!%p2486_p6), [#allocation2], %s1286_s14  ;;  %p2487_p0 = scmp.ne.s32.totalorder (!%p2486_p6), %s2473_s16, 0 }
  0x90   : > { %1837 = dma.done.wait (%p2487_p0), %s361_s10, 256  }
  0x91   : > { %1839 = vsyncadd (%p2487_p0), %s361_s10, 4294967040  ;;  %p2488_p1 = scmp.eq.s32.totalorder %s1955_s9, 0 }
  0x93   : > { %1841 = dma.done.wait (%p2488_p1), [#allocation6], 4096   ;;  %p2489_p2 = pmov %p2488_p1 }
  0x94   : > { %s377_s19 = sand.u32 1, %s1955_s9   ;;  %s1289_s12 = sshll.u32 %s2132_s26, 5 }
  0x95   : > { %1843 = vsyncadd (%p2489_p2), [#allocation6], 4294963200  ;;  %s378_s24 = scalar_lea.sflag [#allocation9], %s377_s19  ;;  %s2150_s11 = scalar_lea.vmem [#allocation8], %s1289_s12 }
  0x96   : > { %1845 = dma.done.wait (%p2487_p0), %s378_s24, 1280  }
  0x97   : > { %1847 = vsyncadd (%p2487_p0), %s378_s24, 4294966016  ;;  %v2156_v0 = vld [vmem:[#allocation5 + $0x78] sm:$0xff]   ;;  %v2161_v2 = vld [vmem:[#allocation5 + $0x70] sm:$0xff]   ;;  %v1884_v33 = vmov 0   ;;  %v1885_v49 = vmov 1.0|1.0   ;;  %v498_v50 = vlaneseq }
  0x98   : > { %v2158_v1 = vld [vmem:[#allocation5 + $0x38] sm:$0xff]   ;;  %1370 = vmatprep.subr.bf16.mxu0 %v2156_v0  ;;  %v2164_v3 = vld [vmem:[#allocation5 + $0x30] sm:$0xff]   ;;  %v2167_v4 = vld [vmem:[#allocation5 + $0x68] sm:$0xff]   ;;  %770 = vmatprep.mubr.bf16.mxu1 %v1884_v33  ;;  %s1459_s20 = smul.u32 48, %s2132_s26  ;;  %s430_s27 = scalar_lea.vmem [#allocation11], %s1286_s14 }
  0x99   : > { %1371 = vmatpush3.bf16.msra.mxu0 %v2158_v1  ;;  %v2170_v5 = vld [vmem:[#allocation5 + $0x28] sm:$0xff]   ;;  %v2173_v6 = vld [vmem:[#allocation5 + $0x60] sm:$0xff]   ;;  %v2179_v8 = vld [vmem:[#allocation5 + $0x58] sm:$0xff]   ;;  %v499_v51 = vshrl.u32 %v498_v50, 7  ;;  %s1369_s5 = sshll.u32 %s1955_s9, 8  ;;  %s1096_s21 = sshll.u32 %s430_s27, 4  ;;  %s1097_s21 = int_to_ptr.vmem [resolvable:$true] %s1096_s21 }
  0x9a   : > { %1372 = vmatprep.subr.bf16.mxu0 %v2161_v2  ;;  %v2176_v7 = vld [vmem:[#allocation5 + $0x20] sm:$0xff]   ;;  %v2182_v9 = vld [vmem:[#allocation5 + $0x18] sm:$0xff]   ;;  %v2185_v10 = vld [vmem:[#allocation5 + $0x50] sm:$0xff]   ;;  %s2308_s1 = scalar_lea.vmem [#allocation10], %s1459_s20  ;;  %s1094_s8 = scalar_lea.hbm %s2449_s7, %s1369_s5 }
  0x9b   : > { %v440_v11 = vld [vmem:[%s2138_s29 + $0x8] sm:$0xff]  ;;  %v2188_v12 = vld [vmem:[#allocation5 + $0x10] sm:$0xff]   ;;  %v2198_v16 = vld [vmem:[#allocation5 + $0x40] sm:$0xff]   ;;  %v500_v52 = vsub.s32 0, %v499_v51  ;;  %v504_v54 = vsub.s32 1, %v499_v51  ;;  %s1077_s22 = scalar_lea.sflag [#allocation4], %s2132_s26 }
  0x9c   : > { %v510_v13 = vpack.c.bf16 %v440_v11, %v440_v11  ;;  %v2190_v14 = vld [vmem:[#allocation5 + $0x48] sm:$0xff]   ;;  %v2201_v17 = vld [vmem:[#allocation5] sm:$0xff]   ;;  %v2223_v20 = vld [vmem:[#allocation7 + $0x74] ss:$8 sps:$4 sm:$0xff]   ;;  %s1768_s10 = scalar_lea.vmem %s1097_s21, 256  ;;  %p2490_p12 = scmp.ne.s32.totalorder %s2474_s17, 0 }
  0x9d   : > { %1373 = vmatpush3.bf16.msra.mxu0 %v2164_v3  ;;  %v2195_v15 = vld [vmem:[#allocation5 + $0x8] sm:$0xff]   ;;  %v439_v18 = vld [vmem:[%s2138_s29] sm:$0xff]  ;;  %738 = vmatprep.subr.bf16.mxu1 %v2223_v20  ;;  %p1769_p7 = scmp.ne.s32.totalorder %s1097_s21, %s1768_s10  ;;  %s1887_s14 = smov [#allocation11]  }
  0x9e   : > { %1374 = vmatprep.subr.bf16.mxu0 %v2167_v4  ;;  %639 = vmatprep.mubr.bf16.mxu0 %v510_v13  ;;  %v509_v19 = vpack.c.bf16 %v439_v18, %v439_v18  ;;  %v2225_v21 = vld [vmem:[#allocation7 + $0x70] ss:$8 sps:$4 sm:$0xff]   ;;  %v2229_v22 = vld [vmem:[#allocation7 + $0x64] ss:$8 sps:$4 sm:$0xff]   ;;  %v2231_v23 = vld [vmem:[#allocation7 + $0x60] ss:$8 sps:$4 sm:$0xff]  }
  0x9f   : > { %739 = vmatpush1.bf16.msra.mxu1 %v2225_v21  ;;  %v2235_v24 = vld [vmem:[#allocation7 + $0x54] ss:$8 sps:$4 sm:$0xff]   ;;  %v2237_v25 = vld [vmem:[#allocation7 + $0x50] ss:$8 sps:$4 sm:$0xff]   ;;  %v2241_v26 = vld [vmem:[#allocation7 + $0x44] ss:$8 sps:$4 sm:$0xff]   ;;  %p1770_p13 = pnand %p1769_p7, %p2490_p12 }
  0xa0   : > { %740 = vmatprep.subr.bf16.mxu1 %v2229_v22  ;;  %v2243_v27 = vld [vmem:[#allocation7 + $0x40] ss:$8 sps:$4 sm:$0xff]   ;;  %v2247_v28 = vld [vmem:[#allocation7 + $0x34] ss:$8 sps:$4 sm:$0xff]   ;;  %v2249_v29 = vld [vmem:[#allocation7 + $0x30] ss:$8 sps:$4 sm:$0xff]  }
  0xa1   : > { %1375 = vmatpush3.bf16.msra.mxu0 %v2170_v5  ;;  %v2252_v30 = vld [vmem:[#allocation7 + $0x24] ss:$8 sps:$4 sm:$0xff]   ;;  %v2255_v31 = vld [vmem:[#allocation7 + $0x20] ss:$8 sps:$4 sm:$0xff]   ;;  %v2258_v32 = vld [vmem:[#allocation7 + $0x14] ss:$8 sps:$4 sm:$0xff]   ;;  %p1771_p3 = pneg %p1770_p13 }
  0xa2   : > { %1376 = vmatprep.subr.bf16.mxu0 %v2173_v6  ;;  %v2262_v34 = vld [vmem:[#allocation7 + $0x10] ss:$8 sps:$4 sm:$0xff]   ;;  %v2265_v35 = vld [vmem:[#allocation7 + $0x4] ss:$8 sps:$4 sm:$0xff]   ;;  %v2268_v36 = vld [vmem:[#allocation7] ss:$8 sps:$4 sm:$0xff]  }
  0xa3   : > { %741 = vmatpush1.bf16.msra.mxu1 %v2231_v23  ;;  %v2276_v38 = vld [vmem:[%s2445_s3] ss:$0 sm:$0xff]  ;;  %s1772_s29 = sshll.u32 %s1887_s14, 4  ;;  %s1773_s29 = int_to_ptr.vmem [resolvable:$false] %s1772_s29 }
  0xa4   : > { %742 = vmatprep.subr.bf16.mxu1 %v2235_v24  ;;  %v508_v47 = vld [vmem:[%s2150_s11] sm:$0xff]  ;;  %s1774_s19 = scalar_lea.vmem %s1773_s29, 512  ;;  %p1775_p8 = scmp.lt.s32.totalorder %s1097_s21, %s1773_s29 }
  0xa5   : > { %1377 = vmatpush3.bf16.msra.mxu0 %v2176_v7  ;;  %v496_v53 = vld [vmem:[%s2446_s4] sm:$0x3]  ;;  %p1776_p9 = scmp.lt.s32.totalorder %s1774_s19, %s1768_s10 }
  0xa6   : > { %1378 = vmatprep.subr.bf16.mxu0 %v2179_v8  ;;  %v2301_v55 = vrot.slane %v496_v53, %v500_v52  ;;  %v2303_v56 = vrot.slane %v496_v53, %v504_v54  ;;  %v1330_v52 = vld [vmem:[%s2150_s11 + $0x8] sm:$0xff] }
  0xa7   : > { %743 = vmatpush1.bf16.msra.mxu1 %v2237_v25  ;;  %p1777_p10 = por %p1776_p9, %p1775_p8 }
  0xa8   : > { %744 = vmatprep.subr.bf16.mxu1 %v2241_v26 }
  0xa9   : > { %1379 = vmatpush3.bf16.msra.mxu0 %v2182_v9  ;;  %p1778_p5 = pnand %p1777_p10, %p1771_p3 }
  0xaa   : > { %1380 = vmatprep.subr.bf16.mxu0 %v2185_v10 }
  0xab   : > { %745 = vmatpush1.bf16.msra.mxu1 %v2243_v27 }
  0xac   : > { %746 = vmatprep.subr.bf16.mxu1 %v2247_v28 }
  0xad   : > { %1381 = vmatpush3.bf16.msra.mxu0 %v2188_v12 }
  0xae   : > { %1382 = vmatprep.subr.bf16.mxu0 %v2190_v14 }
  0xaf   : > { %747 = vmatpush1.bf16.msra.mxu1 %v2249_v29 }
  0xb0   : > { %748 = vmatprep.subr.bf16.mxu1 %v2252_v30 }
  0xb1   : > { %1383 = vmatpush3.bf16.msra.mxu0 %v2195_v15 }
  0xb2   : > { %1384 = vmatprep.subr.bf16.mxu0 %v2198_v16 }
  0xb3   : > { %749 = vmatpush1.bf16.msra.mxu1 %v2255_v31 }
  0xb4   : > { %750 = vmatprep.subr.bf16.mxu1 %v2258_v32 }
  0xb5   : > { %1385 = vmatpush3.bf16.msra.mxu0 %v2201_v17 }
  0xb6   : > { %1392 = vmatprep.subr.bf16.mxu0 %v2156_v0 }
  0xb7   : > { %751 = vmatpush1.bf16.msra.mxu1 %v2262_v34 }
  0xb8   : > { %640 = vmatmul.mubr.bf16.vlgmr.msra.gmra.mxu0 %v509_v19  ;;  %752 = vmatprep.subr.bf16.mxu1 %v2265_v35 }
  0xb9   : > { %1393 = vmatpush3.bf16.msra.mxu0 %v2158_v1 }
  0xba   : > { %1394 = vmatprep.subr.bf16.mxu0 %v2161_v2 }
  0xbb   : > { %753 = vmatpush1.bf16.msra.mxu1 %v2268_v36 }
  0xbc   : > { %851 = vmatprep.subr.bf16.mxu1 %v2223_v20 }
  0xbd   : > { %1395 = vmatpush3.bf16.msra.mxu0 %v2164_v3 }
  0xbe   : > { %1396 = vmatprep.subr.bf16.mxu0 %v2167_v4 }
  0xc1   : > { %1397 = vmatpush3.bf16.msra.mxu0 %v2170_v5 }
  0xc2   : > { %1398 = vmatprep.subr.bf16.mxu0 %v2173_v6 }
  0xc5   : > { %1399 = vmatpush3.bf16.msra.mxu0 %v2176_v7 }
  0xc6   : > { %1400 = vmatprep.subr.bf16.mxu0 %v2179_v8 }
  0xc9   : > { %1401 = vmatpush3.bf16.msra.mxu0 %v2182_v9 }
  0xca   : > { %1402 = vmatprep.subr.bf16.mxu0 %v2185_v10 }
  0xcd   : > { %1403 = vmatpush3.bf16.msra.mxu0 %v2188_v12 }
  0xce   : > { %1404 = vmatprep.subr.bf16.mxu0 %v2190_v14 }
  0xd1   : > { %1405 = vmatpush3.bf16.msra.mxu0 %v2195_v15 }
  0xd2   : > { %1406 = vmatprep.subr.bf16.mxu0 %v2198_v16 }
  0xd5   : > { %1407 = vmatpush3.bf16.msra.mxu0 %v2201_v17 }
  0xd6   : > { %1414 = vmatprep.subr.bf16.mxu0 %v2156_v0 }
 0x178   : > { %v1386_v37 = vpop.f32.mrf.mxu0 }
 0x17a   : > { %v1387_v39 = vpop.f32.mrf.mxu0 }
 0x17b   : > { %v1388_v40 = vadd.f32 %v1387_v39, %v1386_v37  ;;  %v655_v37 = vld [vmem:[%s2308_s1] sm:$0xff] }
 0x17c   : > { %v1389_v41 = vpop.f32.mrf.mxu0 }
 0x17d   : > { %v642_v42 = vadd.f32 %v1388_v40, %v2276_v38  ;;  %v656_v40 = vld [vmem:[%s2308_s1 + $0x8] sm:$0xff] }
 0x17e   : > { %v1390_v43 = vpop.f32.mrf.mxu0 }
 0x17f   : > { %v1309_v44 = vmul.f32 -1.442695, %v642_v42 }
 0x181   : > { %1592 = vpow2.f32 %v1309_v44 }
 0x18e   : > { %v1593_v45 = vpop.eup %1592 }
 0x18f   : > { %v650_v46 = vadd.f32 1.0, %v1593_v45 }
 0x191   : > { %1594 = vrcp.f32 %v650_v46 }
 0x19e   : > { %v1595_v48 = vpop.eup %1594 }
 0x19f   : > { %vm653_vm0 = vcmp.gt.f32.partialorder %v1595_v48, %v508_v47 }
 0x1a0   : > { %vm1326_vm1 = vmpackc.low %vm653_vm0, %vm653_vm0 }
 0x1a1   : > { %1327 = vmatmul.mubr.msk.bf16.vlgmr.msra.gmra.mxu1 %vm1326_vm1, %v1885_v49 }
 0x1a2   : > { %852 = vmatpush1.bf16.msra.mxu1 %v2225_v21  ;;  %883 = vmatprep.mubr.bf16.mxu1 %v1884_v33 }
 0x1a3   : > { %853 = vmatprep.subr.bf16.mxu1 %v2229_v22 }
 0x1a6   : > { %854 = vmatpush1.bf16.msra.mxu1 %v2231_v23 }
 0x1a7   : > { %855 = vmatprep.subr.bf16.mxu1 %v2235_v24 }
 0x1aa   : > { %856 = vmatpush1.bf16.msra.mxu1 %v2237_v25 }
 0x1ab   : > { %857 = vmatprep.subr.bf16.mxu1 %v2241_v26 }
 0x1ae   : > { %858 = vmatpush1.bf16.msra.mxu1 %v2243_v27 }
 0x1af   : > { %859 = vmatprep.subr.bf16.mxu1 %v2247_v28 }
 0x1b2   : > { %860 = vmatpush1.bf16.msra.mxu1 %v2249_v29 }
 0x1b3   : > { %861 = vmatprep.subr.bf16.mxu1 %v2252_v30 }
 0x1b6   : > { %862 = vmatpush1.bf16.msra.mxu1 %v2255_v31 }
 0x1b7   : > { %863 = vmatprep.subr.bf16.mxu1 %v2258_v32 }
 0x1ba   : > { %864 = vmatpush1.bf16.msra.mxu1 %v2262_v34 }
 0x1bb   : > { %865 = vmatprep.subr.bf16.mxu1 %v2265_v35 }
 0x1be   : > { %866 = vmatpush1.bf16.msra.mxu1 %v2268_v36 }
 0x1bf   : > { %964 = vmatprep.subr.bf16.mxu1 %v2223_v20 }
 0x261   : > { %v772_v57 = vpop.f32.mrf.mxu1 }
 0x262   : > { %v773_v58 = vadd.f32 %v772_v57, %v2301_v55 }
 0x263   : > { %v774_v59 = vpop.f32.mrf.mxu1 }
 0x264   : > { %v1328_v60 = vmul.f32 -1.442695, %v773_v58  ;;  %v775_v61 = vadd.f32 %v774_v59, %v2303_v56 }
 0x265   : > { %v776_v62 = vpop.f32.mrf.mxu1 }
 0x266   : > { %1596 = vpow2.f32 %v1328_v60  ;;  %v1329_v63 = vmul.f32 -1.442695, %v775_v61 }
 0x267   : > { %v777_v11 = vpop.f32.mrf.mxu1 }
 0x268   : > { %1598 = vpow2.f32 %v1329_v63  ;;  %v1348_v63 = vld [vmem:[%s2308_s1 + $0x20] sm:$0xff]  ;;  %v1349_v11 = vld [vmem:[%s2308_s1 + $0x28] sm:$0xff] }
 0x273   : > { %v1597_v13 = vpop.eup %1596 }
 0x274   : > { %v785_v18 = vadd.f32 1.0, %v1597_v13 }
 0x275   : > { %v1599_v19 = vpop.eup %1598 }
 0x276   : > { %1600 = vrcp.f32 %v785_v18  ;;  %v786_v20 = vadd.f32 1.0, %v1599_v19 }
 0x278   : > { %1602 = vrcp.f32 %v786_v20 }
 0x283   : > { %v1601_v39 = vpop.eup %1600 }
 0x284   : > { %vm791_vm2 = vcmp.gt.f32.partialorder %v1601_v39, %v655_v37 }
 0x285   : > { %v1603_v41 = vpop.eup %1602  ;;  %vm1333_vm5 = vmpackc.low %vm791_vm2, %vm791_vm2 }
 0x286   : > { %vm792_vm3 = vcmp.gt.f32.partialorder %v1603_v41, %v656_v40 }
 0x287   : > { %vm1331_vm4 = vmpackc.low %vm792_vm3, %vm792_vm3 }
 0x288   : > { %1332 = vmatprep.mubr.msk.bf16.mxu0 %vm1331_vm4, %v1885_v49 }
 0x289   : > { %1334 = vmatmul.mubr.msk.bf16.vlgmr.msra.gmra.mxu0 %vm1333_vm5, %v1885_v49 }
 0x28a   : > { %1415 = vmatpush3.bf16.msra.mxu0 %v2158_v1 }
 0x28b   : > { %1416 = vmatprep.subr.bf16.mxu0 %v2161_v2 }
 0x28e   : > { %1417 = vmatpush3.bf16.msra.mxu0 %v2164_v3 }
 0x28f   : > { %1418 = vmatprep.subr.bf16.mxu0 %v2167_v4 }
 0x292   : > { %1419 = vmatpush3.bf16.msra.mxu0 %v2170_v5 }
 0x293   : > { %1420 = vmatprep.subr.bf16.mxu0 %v2173_v6 }
 0x296   : > { %1421 = vmatpush3.bf16.msra.mxu0 %v2176_v7 }
 0x297   : > { %1422 = vmatprep.subr.bf16.mxu0 %v2179_v8 }
 0x29a   : > { %1423 = vmatpush3.bf16.msra.mxu0 %v2182_v9 }
 0x29b   : > { %1424 = vmatprep.subr.bf16.mxu0 %v2185_v10 }
 0x29e   : > { %1425 = vmatpush3.bf16.msra.mxu0 %v2188_v12 }
 0x29f   : > { %1426 = vmatprep.subr.bf16.mxu0 %v2190_v14 }
 0x2a2   : > { %1427 = vmatpush3.bf16.msra.mxu0 %v2195_v15 }
 0x2a3   : > { %1428 = vmatprep.subr.bf16.mxu0 %v2198_v16 }
 0x2a6   : > { %1429 = vmatpush3.bf16.msra.mxu0 %v2201_v17 }
 0x2a7   : > { %1436 = vmatprep.subr.bf16.mxu0 %v2156_v0 }
 0x349   : > { %v1408_v42 = vpop.f32.mrf.mxu0 }
 0x34b   : > { %v1409_v43 = vpop.f32.mrf.mxu0 }
 0x34c   : > { %v1410_v44 = vadd.f32 %v1409_v43, %v1408_v42 }
 0x34d   : > { %v1411_v45 = vpop.f32.mrf.mxu0 }
 0x34e   : > { %v834_v46 = vadd.f32 %v1410_v44, %v2276_v38 }
 0x34f   : > { %v1412_v47 = vpop.f32.mrf.mxu0 }
 0x350   : > { %v1335_v48 = vmul.f32 -1.442695, %v834_v46 }
 0x352   : > { %1604 = vpow2.f32 %v1335_v48 }
 0x35f   : > { %v1605_v50 = vpop.eup %1604 }
 0x360   : > { %v842_v51 = vadd.f32 1.0, %v1605_v50 }
 0x362   : > { %1606 = vrcp.f32 %v842_v51 }
 0x36f   : > { %v1607_v53 = vpop.eup %1606 }
 0x370   : > { %vm845_vm6 = vcmp.gt.f32.partialorder %v1607_v53, %v1330_v52 }
 0x371   : > { %vm1338_vm7 = vmpackc.low %vm845_vm6, %vm845_vm6 }
 0x372   : > { %1339 = vmatmul.mubr.msk.bf16.vlgmr.msra.gmra.mxu1 %vm1338_vm7, %v1885_v49 }
 0x373   : > { %965 = vmatpush1.bf16.msra.mxu1 %v2225_v21  ;;  %996 = vmatprep.mubr.bf16.mxu1 %v1884_v33 }
 0x374   : > { %966 = vmatprep.subr.bf16.mxu1 %v2229_v22 }
 0x377   : > { %967 = vmatpush1.bf16.msra.mxu1 %v2231_v23 }
 0x378   : > { %968 = vmatprep.subr.bf16.mxu1 %v2235_v24 }
 0x37b   : > { %969 = vmatpush1.bf16.msra.mxu1 %v2237_v25 }
 0x37c   : > { %970 = vmatprep.subr.bf16.mxu1 %v2241_v26 }
 0x37f   : > { %971 = vmatpush1.bf16.msra.mxu1 %v2243_v27 }
 0x380   : > { %972 = vmatprep.subr.bf16.mxu1 %v2247_v28 }
 0x383   : > { %973 = vmatpush1.bf16.msra.mxu1 %v2249_v29 }
 0x384   : > { %974 = vmatprep.subr.bf16.mxu1 %v2252_v30 }
 0x387   : > { %975 = vmatpush1.bf16.msra.mxu1 %v2255_v31 }
 0x388   : > { %976 = vmatprep.subr.bf16.mxu1 %v2258_v32  ;;  %v1336_v32 = vld [vmem:[%s2308_s1 + $0x10] sm:$0xff] }
 0x38b   : > { %977 = vmatpush1.bf16.msra.mxu1 %v2262_v34  ;;  %v1337_v34 = vld [vmem:[%s2308_s1 + $0x18] sm:$0xff] }
 0x38c   : > { %978 = vmatprep.subr.bf16.mxu1 %v2265_v35 }
 0x38f   : > { %979 = vmatpush1.bf16.msra.mxu1 %v2268_v36 }
 0x432   : > { %v885_v0 = vpop.f32.mrf.mxu1 }
 0x433   : > { %v886_v21 = vadd.f32 %v885_v0, %v2301_v55 }
 0x434   : > { %v887_v22 = vpop.f32.mrf.mxu1 }
 0x435   : > { %v1340_v23 = vmul.f32 -1.442695, %v886_v21  ;;  %v888_v24 = vadd.f32 %v887_v22, %v2303_v56 }
 0x436   : > { %v889_v25 = vpop.f32.mrf.mxu1 }
 0x437   : > { %1608 = vpow2.f32 %v1340_v23  ;;  %v1341_v26 = vmul.f32 -1.442695, %v888_v24 }
 0x438   : > { %v890_v27 = vpop.f32.mrf.mxu1 }
 0x439   : > { %1610 = vpow2.f32 %v1341_v26 }
 0x444   : > { %v1609_v28 = vpop.eup %1608 }
 0x445   : > { %v898_v29 = vadd.f32 1.0, %v1609_v28 }
 0x446   : > { %v1611_v30 = vpop.eup %1610 }
 0x447   : > { %1612 = vrcp.f32 %v898_v29  ;;  %v899_v31 = vadd.f32 1.0, %v1611_v30 }
 0x449   : > { %1614 = vrcp.f32 %v899_v31 }
 0x454   : > { %v1613_v33 = vpop.eup %1612 }
 0x455   : > { %vm904_vm8 = vcmp.gt.f32.partialorder %v1613_v33, %v1336_v32 }
 0x456   : > { %v1615_v35 = vpop.eup %1614  ;;  %vm1345_vm11 = vmpackc.low %vm904_vm8, %vm904_vm8 }
 0x457   : > { %vm905_vm9 = vcmp.gt.f32.partialorder %v1615_v35, %v1337_v34 }
 0x458   : > { %vm1343_vm10 = vmpackc.low %vm905_vm9, %vm905_vm9 }
 0x459   : > { %1344 = vmatprep.mubr.msk.bf16.mxu0 %vm1343_vm10, %v1885_v49 }
 0x45a   : > { %1346 = vmatmul.mubr.msk.bf16.vlgmr.msra.gmra.mxu0 %vm1345_vm11, %v1885_v49 }
 0x45b   : > { %1437 = vmatpush3.bf16.msra.mxu0 %v2158_v1 }
 0x45c   : > { %1438 = vmatprep.subr.bf16.mxu0 %v2161_v2 }
 0x45f   : > { %1439 = vmatpush3.bf16.msra.mxu0 %v2164_v3 }
 0x460   : > { %1440 = vmatprep.subr.bf16.mxu0 %v2167_v4 }
 0x463   : > { %1441 = vmatpush3.bf16.msra.mxu0 %v2170_v5 }
 0x464   : > { %1442 = vmatprep.subr.bf16.mxu0 %v2173_v6 }
 0x467   : > { %1443 = vmatpush3.bf16.msra.mxu0 %v2176_v7 }
 0x468   : > { %1444 = vmatprep.subr.bf16.mxu0 %v2179_v8 }
 0x46b   : > { %1445 = vmatpush3.bf16.msra.mxu0 %v2182_v9 }
 0x46c   : > { %1446 = vmatprep.subr.bf16.mxu0 %v2185_v10  ;;  %v1342_v10 = vld [vmem:[%s2150_s11 + $0x10] sm:$0xff] }
 0x46f   : > { %1447 = vmatpush3.bf16.msra.mxu0 %v2188_v12 }
 0x470   : > { %1448 = vmatprep.subr.bf16.mxu0 %v2190_v14 }
 0x473   : > { %1449 = vmatpush3.bf16.msra.mxu0 %v2195_v15 }
 0x474   : > { %1450 = vmatprep.subr.bf16.mxu0 %v2198_v16 }
 0x477   : > { %1451 = vmatpush3.bf16.msra.mxu0 %v2201_v17 }
 0x51a   : > { %v1430_v1 = vpop.f32.mrf.mxu0 }
 0x51c   : > { %v1431_v2 = vpop.f32.mrf.mxu0 }
 0x51d   : > { %v1432_v3 = vadd.f32 %v1431_v2, %v1430_v1 }
 0x51e   : > { %v1433_v4 = vpop.f32.mrf.mxu0 }
 0x51f   : > { %v947_v5 = vadd.f32 %v1432_v3, %v2276_v38 }
 0x520   : > { %v1434_v6 = vpop.f32.mrf.mxu0 }
 0x521   : > { %v1347_v7 = vmul.f32 -1.442695, %v947_v5 }
 0x523   : > { %1616 = vpow2.f32 %v1347_v7 }
 0x530   : > { %v1617_v8 = vpop.eup %1616 }
 0x531   : > { %v955_v9 = vadd.f32 1.0, %v1617_v8 }
 0x533   : > { %1618 = vrcp.f32 %v955_v9 }
 0x540   : > { %v1619_v12 = vpop.eup %1618 }
 0x541   : > { %vm958_vm12 = vcmp.gt.f32.partialorder %v1619_v12, %v1342_v10 }
 0x542   : > { %vm1350_vm13 = vmpackc.low %vm958_vm12, %vm958_vm12 }
 0x543   : > { %1351 = vmatmul.mubr.msk.bf16.vlgmr.msra.gmra.mxu1 %vm1350_vm13, %v1885_v49 }
 0x603   : > { %v998_v14 = vpop.f32.mrf.mxu1 }
 0x604   : > { %v999_v15 = vadd.f32 %v998_v14, %v2301_v55 }
 0x605   : > { %v1000_v16 = vpop.f32.mrf.mxu1 }
 0x606   : > { %v1352_v17 = vmul.f32 -1.442695, %v999_v15  ;;  %v1001_v36 = vadd.f32 %v1000_v16, %v2303_v56  ;;  %v1886_v56 = vmov 0.0  }
 0x607   : > { %v1002_v54 = vpop.f32.mrf.mxu1 }
 0x608   : > { %1620 = vpow2.f32 %v1352_v17  ;;  %v1353_v57 = vmul.f32 -1.442695, %v1001_v36 }
 0x609   : > { %v1003_v58 = vpop.f32.mrf.mxu1 }
 0x60a   : > { %1622 = vpow2.f32 %v1353_v57 }
 0x615   : > { %v1621_v59 = vpop.eup %1620 }
 0x616   : > { %v1011_v60 = vadd.f32 1.0, %v1621_v59 }
 0x617   : > { %v1623_v61 = vpop.eup %1622 }
 0x618   : > { %1624 = vrcp.f32 %v1011_v60  ;;  %v1012_v62 = vadd.f32 1.0, %v1623_v61 }
 0x61a   : > { %1626 = vrcp.f32 %v1012_v62 }
 0x625   : > { %v1625_v55 = vpop.eup %1624 }
 0x626   : > { %vm1017_vm14 = vcmp.gt.f32.partialorder %v1625_v55, %v1348_v63 }
 0x627   : > { %v1627_v13 = vpop.eup %1626  ;;  %v1019_v18 = vsel %vm1017_vm14, 1.0, %v1886_v56  ;;  %vm1357_vm1 = vmpackc.low %vm1017_vm14, %vm1017_vm14 }
 0x628   : > { %vm1018_vm15 = vcmp.gt.f32.partialorder %v1627_v13, %v1349_v11  ;;  %1073 = vst [vmem:[%s430_s27] sm:$0xff] %v1019_v18 }
 0x629   : > { %v1020_v19 = vsel %vm1018_vm15, 1.0, %v1886_v56  ;;  %vm1355_vm0 = vmpackc.low %vm1018_vm15, %vm1018_vm15 }
 0x62a   : > { %1356 = vmatprep.mubr.msk.bf16.mxu0 %vm1355_vm0, %v1885_v49  ;;  %1074 = vst [vmem:[%s430_s27 + $0x8] sm:$0xff] %v1020_v19 }
 0x62b   : > { %1358 = vmatmul.mubr.msk.bf16.vlgmr.msra.gmra.mxu0 %vm1357_vm1, %v1885_v49 }
 0x62c   : > { %1781 = shalt.err (!%p1778_p5)
}
 0x62d   : > { %s1782_s12 = scalar_lea.hbm %s1094_s8, 256  ;;  %s1786_s18 = scalar_lea.hbm %s2449_s7, 512 }
 0x62e   : > { %p1783_p11 = scmp.ne.s32.totalorder %s1094_s8, %s1782_s12  ;;  %p1787_p0 = scmp.lt.s32.totalorder %s1094_s8, %s2449_s7 }
 0x62f   : > { %p1788_p1 = scmp.lt.s32.totalorder %s1786_s18, %s1782_s12 }
 0x630   : > { %p1784_p4 = pnand %p1783_p11, %p2490_p12 }
 0x631   : > { %p1789_p2 = por %p1788_p1, %p1787_p0 }
 0x632   : > { %p1785_p6 = pneg %p1784_p4 }
 0x634   : > { %p1790_p7 = pnand %p1789_p2, %p1785_p6 }
 0x636   : > { %1793 = shalt.err (!%p1790_p7)
}
 0x637   : > { %1474 = dma.vmem_to_hbm [thread:$0]  (%p2490_p12), %s1097_s21, 256, %s1094_s8, %s1077_s22   ;;  %v1354_v45 = vld [vmem:[%s2150_s11 + $0x18] sm:$0xff] }
 0x638   : > { %s1291_s20 = sshll.u32 %s2132_s26, 3  ;;  %s1364_s1 = sshll.u32 %s1955_s9, 7 }
 0x639   : > { %s437_s27 = scalar_lea.vmem [#allocation12], %s1291_s20  ;;  %s2491_s8 = sld [smem:[#allocation26_spill]] }
 0x63a   : > { %s1109_s5 = sshll.u32 %s437_s27, 4  ;;  %s1082_s22 = scalar_lea.sflag [#allocation13], %s2132_s26  ;;  %s1110_s5 = int_to_ptr.vmem [resolvable:$true] %s1109_s5 }
 0x63b   : > { %s1794_s10 = scalar_lea.vmem %s1110_s5, 128  ;;  %s1888_s11 = smov [#allocation12]  }
 0x63c   : > { %p1795_p13 = scmp.ne.s32.totalorder %s1110_s5, %s1794_s10  ;;  %s1798_s9 = sshll.u32 %s1888_s11, 4  ;;  %s1799_s9 = int_to_ptr.vmem [resolvable:$false] %s1798_s9 }
 0x63d   : > { %s1800_s14 = scalar_lea.vmem %s1799_s9, 256  ;;  %p1801_p9 = scmp.lt.s32.totalorder %s1110_s5, %s1799_s9 }
 0x63e   : > { %p1796_p3 = pnand %p1795_p13, %p2490_p12  ;;  %p1802_p10 = scmp.lt.s32.totalorder %s1800_s14, %s1794_s10 }
 0x63f   : > { %s2405_s21 = scalar_lea.hbm %s2491_s8, %s1364_s1 }
 0x640   : > { %p1797_p8 = pneg %p1796_p3  ;;  %p1803_p5 = por %p1802_p10, %p1801_p9 }
 0x642   : > { %p1804_p11 = pnand %p1803_p5, %p1797_p8 }
 0x6eb   : > { %v1452_v49 = vpop.f32.mrf.mxu0 }
 0x6ed   : > { %v1453_v20 = vpop.f32.mrf.mxu0 }
 0x6ee   : > { %v1454_v37 = vadd.f32 %v1453_v20, %v1452_v49 }
 0x6ef   : > { %v1455_v39 = vpop.f32.mrf.mxu0 }
 0x6f0   : > { %v1060_v40 = vadd.f32 %v1454_v37, %v2276_v38 }
 0x6f1   : > { %v1456_v41 = vpop.f32.mrf.mxu0 }
 0x6f2   : > { %v1359_v42 = vmul.f32 -1.442695, %v1060_v40 }
 0x6f4   : > { %1628 = vpow2.f32 %v1359_v42 }
 0x701   : > { %v1629_v43 = vpop.eup %1628 }
 0x702   : > { %v1068_v44 = vadd.f32 1.0, %v1629_v43 }
 0x704   : > { %1630 = vrcp.f32 %v1068_v44 }
 0x711   : > { %v1631_v46 = vpop.eup %1630 }
 0x712   : > { %vm1071_vm2 = vcmp.gt.f32.partialorder %v1631_v46, %v1354_v45 }
 0x713   : > { %v1072_v38 = vsel %vm1071_vm2, 1.0, %v1886_v56 }
 0x714   : > { %1075 = vst [vmem:[%s437_s27] sm:$0xff] %v1072_v38 }
 0x715   : > { %1807 = shalt.err (!%p1804_p11)
}
 0x716   : > { %s1808_s29 = scalar_lea.hbm %s2405_s21, 128  ;;  %s1812_s12 = scalar_lea.hbm %s2491_s8, 256 }
 0x717   : > { %p1809_p4 = scmp.ne.s32.totalorder %s2405_s21, %s1808_s29  ;;  %p1813_p1 = scmp.lt.s32.totalorder %s2405_s21, %s2491_s8 }
 0x718   : > { %p1814_p2 = scmp.lt.s32.totalorder %s1812_s12, %s1808_s29 }
 0x719   : > { %p1810_p6 = pnand %p1809_p4, %p2490_p12 }
 0x71a   : > { %p1815_p7 = por %p1814_p2, %p1813_p1 }
 0x71b   : > { %p1811_p0 = pneg %p1810_p6 }
 0x71d   : > { %p1816_p13 = pnand %p1815_p7, %p1811_p0 }
 0x71f   : > { %1819 = shalt.err (!%p1816_p13)
}
 0x720   : > { %1475 = dma.vmem_to_hbm [thread:$0]  (%p2490_p12), %s1110_s5, 128, %s2405_s21, %s1082_s22  }
 0x721 PF: > { %s2492_s18 = sld [smem:[#allocation19_spill]]  ;;  %p2495_p8 = scmp.ge.s32.totalorder %s1870_s30, 2 }
 0x722   : > { %s2493_s13 = sld [smem:[#allocation23_spill]] }
 0x727   : > { %s1121_s23 = sand.u32 1, %s2492_s18  }
 0x728   : > { %p2494_p3 = scmp.ne.s32.totalorder %s2493_s13, 0  ;;  %s1122_s20 = scalar_lea.sflag [#allocation4], %s1121_s23 }
 0x72a   : > { %p1496_p9 = pnand %p2495_p8, %p2494_p3 }
 0x72c   : > { %p1497_p10 = pneg %p1496_p9 }
 0x72e   : > { %1849 = dma.done.wait (%p1497_p10), %s1122_s20, 256  }
 0x72f   : > { %1851 = vsyncadd (%p1497_p10), %s1122_s20, 4294967040  ;;  %s1131_s1 = scalar_lea.sflag [#allocation13], %s1121_s23 }
 0x730   : > { %1853 = dma.done.wait (%p1497_p10), %s1131_s1, 128  }
 0x731   : > { %1855 = vsyncadd (%p1497_p10), %s1131_s1, 4294967168  ;;  %s2496_s30 = sld [smem:[#allocation21_spill]]  ;;  %s2499_s27 = smov %s1862_s28 }
 0x732   : > { %s2497_s17 = sld [smem:[#allocation20_spill]] }
 0x733   : > { %s2498_s29 = sld [smem:[#allocation22_spill]] }
 0x737   : > { %p29_p12 = scmp.ge.s32.totalorder %s2496_s30, 4  }
 0x738   : > { %s2500_s28 = smov %s2497_s17 }
 0x739   :  { %31 = sbr.rel (!%p29_p12) target bundleno = 14 (0xe), region = 147 }
 0x73e   :  { %1136 = vsyncpa [#allocation3], 1 }
 0x73f   :  { %1138 = vsyncpa [#allocation3 + $0x1], 1 }
 0x740   :  { %1139 = vsyncpa [#allocation6], 1 }
 0x741   :  { %1140 = vsyncpa [#allocation9], 1 }
 0x742   :  { %1142 = vsyncpa [#allocation9 + $0x1], 1 }
 0x743   :  { %1143 = vsyncpa [#allocation4], 1 }
 0x744   :  { %1145 = vsyncpa [#allocation4 + $0x1], 1 }
 0x745   :  { %1146 = vsyncpa [#allocation13], 1 }
 0x746   :  { %1148 = vsyncpa [#allocation13 + $0x1], 1 }

</bundles_post_ra>
